<compile_context>
chip_gen: v5e
topology: v5e:2x2
jax: 0.10.0
libtpu: 0.0.40
codegen_flags: <defaults>
</compile_context>

<pallas_src>
import functools

import jax
import jax.numpy as jnp
from jax.experimental import pallas as pl
from jax.experimental.pallas import tpu as pltpu

BN_EPS = 1e-3
LANE = 128


def _round_up(n, m):
    return (n + m - 1) // m * m


def _pick_tile_b(batch):
    """Largest batch tile in {512, 256, 128} that still keeps >= 2 grid steps."""
    tile = 512
    while tile > 128 and (batch + tile - 1) // tile < 2:
        tile //= 2
    return tile


def _fused_fc_kernel(xc_ref, w1_ref, b1_ref, wh_ref, bh_ref, out_ref, *, n_out):
    """Linear (eval-BN pre-folded) -> ReLU -> packed mean|var head -> masked exp."""
    # FCLayers "Layer 0": Linear with BN folded in, then ReLU (dropout == id at eval).
    h = jnp.dot(xc_ref[...], w1_ref[...], preferred_element_type=jnp.float32)
    h = jnp.maximum(h + b1_ref[...], 0.0)

    # Packed heads: one lane-dense matmul; mean in cols [0, n_out), exp-variance
    # in cols [n_out, 2*n_out); remaining cols are zero padding.
    p = jnp.dot(h.astype(jnp.bfloat16), wh_ref[...],
                preferred_element_type=jnp.float32) + bh_ref[...]

    # exp() only on the variance / padding columns (f32 EUP path; v5e-safe).
    col = jax.lax.broadcasted_iota(jnp.int32, p.shape, 1)
    out_ref[...] = jnp.where(col >= n_out, jnp.exp(p), p)


def prepare_params(params):
    """Host-side prep: fold eval-mode BN into layer 0, pack heads, pad, cast bf16."""
    # Fold BatchNorm1d(eps=1e-3, eval) into the first linear layer.
    scale = params["gamma"] * jax.lax.rsqrt(params["running_var"] + BN_EPS)  # (1, H)
    w1f = params["w1"] * scale                                               # (K, H)
    b1f = (params["b1"] - params["running_mean"]) * scale + params["beta"]   # (1, H)

    K, H = w1f.shape
    N = params["wm"].shape[1]
    Kp, Hp = _round_up(K, LANE), _round_up(H, LANE)
    Wp = _round_up(2 * N, LANE)          # packed mean|var head width

    # Padded hidden units have zero weight + zero bias -> ReLU(0) = 0, and padded
    # head rows/cols are zero, so padding never changes the real outputs.
    w1p = jnp.zeros((Kp, Hp), jnp.float32).at[:K, :H].set(w1f)
    b1p = jnp.zeros((1, Hp), jnp.float32).at[:, :H].set(b1f)

    whp = jnp.zeros((Hp, Wp), jnp.float32)
    whp = whp.at[:H, :N].set(params["wm"]).at[:H, N:2 * N].set(params["wv"])
    bhp = jnp.zeros((1, Wp), jnp.float32)
    bhp = bhp.at[:, :N].set(params["bm"]).at[:, N:2 * N].set(params["bv"])

    return {
        "w1": w1p.astype(jnp.bfloat16),   # matmul operands in bf16
        "b1": b1p,                        # biases stay f32 (added post-accumulation)
        "wh": whp.astype(jnp.bfloat16),
        "bh": bhp,
    }


@functools.partial(jax.jit, static_argnames=("n_output",))
def decoder_forward(xc, w1, b1, wh, bh, *, n_output):
    """xc: (B, K) float32; prepared/padded params; returns (p_m, p_v) at (B, n_output)."""
    B, K = xc.shape
    Kp, Hp = w1.shape
    Wp = wh.shape[1]

    tile_b = _pick_tile_b(B)
    Bp = _round_up(B, tile_b)

    # Single bf16 pad for activations (no padded f32 intermediate pass).
    xcp = jnp.zeros((Bp, Kp), jnp.bfloat16).at[:B, :K].set(xc.astype(jnp.bfloat16))

    # Explicit VMEM budget: resident weights + double-buffered act/out tiles (+slack).
    resident = w1.size * 2 + b1.size * 4 + wh.size * 2 + bh.size * 4
    tiles = tile_b * Kp * 2 + tile_b * Wp * 4
    vmem_limit = int(min(max(4 * (resident + tiles), 4 << 20), 64 << 20))

    out = pl.pallas_call(
        functools.partial(_fused_fc_kernel, n_out=n_output),
        out_shape=jax.ShapeDtypeStruct((Bp, Wp), jnp.float32),
        grid_spec=pltpu.PrefetchScalarGridSpec(
            num_scalar_prefetch=0,
            grid=(Bp // tile_b,),
            in_specs=[
                # Activations tile over the batch grid axis (double-buffered).
                pl.BlockSpec((tile_b, Kp), lambda i: (i, 0)),
                # Weights / biases: constant block index -> stay resident in VMEM.
                pl.BlockSpec((Kp, Hp), lambda i: (0, 0)),
                pl.BlockSpec((1, Hp), lambda i: (0, 0)),
                pl.BlockSpec((Hp, Wp), lambda i: (0, 0)),
                pl.BlockSpec((1, Wp), lambda i: (0, 0)),
            ],
            # One lane-dense output slab (mean|var packed), split in the wrapper.
            out_specs=pl.BlockSpec((tile_b, Wp), lambda i: (i, 0)),
        ),
        compiler_params=pltpu.CompilerParams(
            dimension_semantics=("parallel",),   # shard batch tiles across TCs (v7x)
            vmem_limit_bytes=vmem_limit,
        ),
    )(xcp, w1, b1, wh, bh)

    # Slice the packed slab: mean cols [0, N), variance cols [N, 2N).
    return out[:B, :n_output], out[:B, n_output:2 * n_output]


def init_params(key, n_in_total, n_hidden, n_output):
    """Deterministic synthetic parameters (weights stored as (in, out))."""
    ks = jax.random.split(key, 8)
    s = 0.1
    return {
        "w1": s * jax.random.normal(ks[0], (n_in_total, n_hidden), jnp.float32),
        "b1": s * jax.random.normal(ks[1], (1, n_hidden), jnp.float32),
        "gamma": 1.0 + s * jax.random.normal(ks[2], (1, n_hidden), jnp.float32),
        "beta": s * jax.random.normal(ks[3], (1, n_hidden), jnp.float32),
        "running_mean": s * jax.random.normal(ks[4], (1, n_hidden), jnp.float32),
        "running_var": jnp.abs(1.0 + s * jax.random.normal(ks[5], (1, n_hidden), jnp.float32)),
        "wm": s * jax.random.normal(ks[6], (n_hidden, n_output), jnp.float32),
        "bm": jnp.zeros((1, n_output), jnp.float32),
        "wv": s * jax.random.normal(ks[7], (n_hidden, n_output), jnp.float32),
        "bv": jnp.zeros((1, n_output), jnp.float32),
    }


def reference_forward(xc, params):
    """Pure-JAX f32 reference matching the PyTorch forward (eval mode)."""
    h = xc @ params["w1"] + params["b1"]
    h = (h - params["running_mean"]) / jnp.sqrt(params["running_var"] + BN_EPS)
    h = h * params["gamma"] + params["beta"]
    h = jnp.maximum(h, 0.0)
    pm = h @ params["wm"] + params["bm"]
    pv = jnp.exp(h @ params["wv"] + params["bv"])
    return pm, pv


if __name__ == "__main__":
    # Small shapes consistent with the module:
    #   FCLayers(n_in=32, n_out=32, n_cat_list=[4], n_layers=1) + mean/var heads (16).
    # B=256 exercises two batch tiles on the parallel grid axis.
    B = 256
    n_input = 32
    n_cat = 4
    n_hidden = 32
    n_output = 16

    key = jax.random.PRNGKey(0)
    k_x, k_cat, k_p = jax.random.split(key, 3)

    x = jax.random.normal(k_x, (B, n_input), jnp.float32)
    cat = jax.random.randint(k_cat, (B,), 0, n_cat)
    one_hot = jax.nn.one_hot(cat, n_cat, dtype=jnp.float32)

    # FCLayers injects covariates by concatenating one-hot encodings (glue in JAX).
    xc = jnp.concatenate([x, one_hot], axis=-1)            # (B, n_input + n_cat)

    params = init_params(k_p, n_input + n_cat, n_hidden, n_output)
    prep = prepare_params(params)

    p_m, p_v = decoder_forward(xc, prep["w1"], prep["b1"], prep["wh"], prep["bh"],
                               n_output=n_output)
    jax.block_until_ready((p_m, p_v))

    # Correctness check vs. pure-f32 reference (bf16 matmuls -> looser tolerance).
    rm, rv = reference_forward(xc, params)
    assert p_m.shape == (B, n_output) and p_v.shape == (B, n_output)
    assert jnp.allclose(p_m, rm, atol=3e-2, rtol=3e-2)
    assert jnp.allclose(p_v, rv, atol=3e-2, rtol=3e-2)
    assert bool(jnp.all(p_v > 0))

    print("KERNEL_OK")
</pallas_src>

<mosaic_0001>
module attributes {stable_mosaic.version = 11 : i64} {
  func.func @_fused_fc_kernel(%arg0: i32, %arg1: memref<128x128xbf16, #tpu.memory_space<vmem>>, %arg2: memref<128x128xbf16, #tpu.memory_space<vmem>>, %arg3: memref<1x128xf32, #tpu.memory_space<vmem>>, %arg4: memref<128x128xbf16, #tpu.memory_space<vmem>>, %arg5: memref<1x128xf32, #tpu.memory_space<vmem>>, %arg6: memref<128x128xf32, #tpu.memory_space<vmem>>) attributes {dimension_semantics = [#tpu.dimension_semantics<parallel>], iteration_bounds = array<i64: 2>, scalar_prefetch = 0 : i64, scratch_operands = 0 : i64, tpu.core_type = #tpu.core_type<tc>, window_params = [{transform_indices = @transform_0, window_bounds = array<i64: 128, 128>}, {pipeline_mode = #tpu.pipeline_mode<synchronous>, transform_indices = @transform_1, window_bounds = array<i64: 128, 128>}, {pipeline_mode = #tpu.pipeline_mode<synchronous>, transform_indices = @transform_2, window_bounds = array<i64: 1, 128>}, {pipeline_mode = #tpu.pipeline_mode<synchronous>, transform_indices = @transform_3, window_bounds = array<i64: 128, 128>}, {pipeline_mode = #tpu.pipeline_mode<synchronous>, transform_indices = @transform_4, window_bounds = array<i64: 1, 128>}, {transform_indices = @transform_5, window_bounds = array<i64: 128, 128>}]} {
    %c0 = arith.constant 0 : index
    %c0_0 = arith.constant 0 : index
    %0 = vector.load %arg1[%c0, %c0_0] : memref<128x128xbf16, #tpu.memory_space<vmem>>, vector<128x128xbf16>
    %c0_1 = arith.constant 0 : index
    %c0_2 = arith.constant 0 : index
    %1 = vector.load %arg2[%c0_1, %c0_2] : memref<128x128xbf16, #tpu.memory_space<vmem>>, vector<128x128xbf16>
    %cst = arith.constant dense<0.000000e+00> : vector<128x128xf32>
    %2 = tpu.matmul %0, %1, %cst {dimension_numbers = #tpu.dot_dimension_numbers<[1], [0], [0], [1], [0, 0, 1, 1], [], []>} : vector<128x128xbf16>, vector<128x128xbf16>, vector<128x128xf32> -> vector<128x128xf32>
    %c0_3 = arith.constant 0 : index
    %c0_4 = arith.constant 0 : index
    %3 = vector.load %arg3[%c0_3, %c0_4] : memref<1x128xf32, #tpu.memory_space<vmem>>, vector<1x128xf32>
    %4 = vector.broadcast %3 : vector<1x128xf32> to vector<128x128xf32>
    %5 = arith.addf %2, %4 : vector<128x128xf32>
    %cst_5 = arith.constant 0.000000e+00 : f32
    %6 = vector.broadcast %cst_5 : f32 to vector<128x128xf32>
    %7 = arith.maximumf %5, %6 : vector<128x128xf32>
    %8 = arith.truncf %7 : vector<128x128xf32> to vector<128x128xbf16>
    %c0_6 = arith.constant 0 : index
    %c0_7 = arith.constant 0 : index
    %9 = vector.load %arg4[%c0_6, %c0_7] : memref<128x128xbf16, #tpu.memory_space<vmem>>, vector<128x128xbf16>
    %cst_8 = arith.constant dense<0.000000e+00> : vector<128x128xf32>
    %10 = tpu.matmul %8, %9, %cst_8 {dimension_numbers = #tpu.dot_dimension_numbers<[1], [0], [0], [1], [0, 0, 1, 1], [], []>} : vector<128x128xbf16>, vector<128x128xbf16>, vector<128x128xf32> -> vector<128x128xf32>
    %c0_9 = arith.constant 0 : index
    %c0_10 = arith.constant 0 : index
    %11 = vector.load %arg5[%c0_9, %c0_10] : memref<1x128xf32, #tpu.memory_space<vmem>>, vector<1x128xf32>
    %12 = vector.broadcast %11 : vector<1x128xf32> to vector<128x128xf32>
    %13 = arith.addf %10, %12 : vector<128x128xf32>
    %14 = tpu.iota {dimensions = array<i32: 1>} : vector<128x128xi32>
    %c16_i32 = arith.constant 16 : i32
    %15 = vector.broadcast %c16_i32 : i32 to vector<128x128xi32>
    %16 = arith.cmpi sge, %14, %15 : vector<128x128xi32>
    %17 = math.exp %13 : vector<128x128xf32>
    %18 = arith.select %16, %17, %13 : vector<128x128xi1>, vector<128x128xf32>
    %c0_11 = arith.constant 0 : index
    %c0_12 = arith.constant 0 : index
    %19 = vector.load %arg6[%c0_11, %c0_12] : memref<128x128xf32, #tpu.memory_space<vmem>>, vector<128x128xf32>
    tpu.vector_store %arg6[%c0_11, %c0_12], %18 {strides = array<i32>} : memref<128x128xf32, #tpu.memory_space<vmem>>, vector<128x128xf32>,
    return
  }
  func.func @transform_0(%arg0: i32) -> (i32, i32) {
    %c0_i32 = arith.constant 0 : i32
    %c0_i32_0 = arith.constant 0 : i32
    return %arg0, %c0_i32 : i32, i32
  }
  func.func @transform_1(%arg0: i32) -> (i32, i32) {
    %c0_i32 = arith.constant 0 : i32
    %c0_i32_0 = arith.constant 0 : i32
    %c0_i32_1 = arith.constant 0 : i32
    return %c0_i32, %c0_i32_0 : i32, i32
  }
  func.func @transform_2(%arg0: i32) -> (i32, i32) {
    %c0_i32 = arith.constant 0 : i32
    %c0_i32_0 = arith.constant 0 : i32
    %c0_i32_1 = arith.constant 0 : i32
    return %c0_i32, %c0_i32_0 : i32, i32
  }
  func.func @transform_3(%arg0: i32) -> (i32, i32) {
    %c0_i32 = arith.constant 0 : i32
    %c0_i32_0 = arith.constant 0 : i32
    %c0_i32_1 = arith.constant 0 : i32
    return %c0_i32, %c0_i32_0 : i32, i32
  }
  func.func @transform_4(%arg0: i32) -> (i32, i32) {
    %c0_i32 = arith.constant 0 : i32
    %c0_i32_0 = arith.constant 0 : i32
    %c0_i32_1 = arith.constant 0 : i32
    return %c0_i32, %c0_i32_0 : i32, i32
  }
  func.func @transform_5(%arg0: i32) -> (i32, i32) {
    %c0_i32 = arith.constant 0 : i32
    %c0_i32_0 = arith.constant 0 : i32
    return %arg0, %c0_i32 : i32, i32
  }
}

</mosaic_0001>

<bundles_post_ra>
// kernel: decoder_forward.1
= control target key start
LH: loop header
LB: loop body
LE: loop exit
PB: predicated region body
PF: predicated region fallthrough
CT: control target
= control target key end

     0   :  { %s900_s18 = smov 0   ;;  %s1046_s0 = inlined_call_operand.vmem [shape: bf16[256,128], index: 0, kind: input, shape index: {}]   ;;  %s1047_s1 = inlined_call_operand.vmem [shape: bf16[128,128], index: 1, kind: input, shape index: {}]   ;;  %s1048_s2 = inlined_call_operand.vmem [shape: f32[1,128], index: 2, kind: input, shape index: {}]   ;;  %s1049_s3 = inlined_call_operand.vmem [shape: bf16[128,128], index: 3, kind: input, shape index: {}]   ;;  %s1050_s4 = inlined_call_operand.vmem [shape: f32[1,128], index: 4, kind: input, shape index: {}]   ;;  %s1051_s5 = inlined_call_operand.vmem [shape: f32[256,128], index: 5, kind: output, shape index: {}]  }
   0x1 LB: > { %s673_s19 = sadd.s32 4294967295, %s868_s18   ;;  %p677_p0 = scmp.ge.s32.totalorder %s868_s18, 1  ;;  %s868_s18 = sphi %s900_s18, %s15_s18  }
   0x2   : > { %p188_p1 = scmp.lt.s32.totalorder %s868_s18, 3 }
   0x4   : > { %p189_p2 = pnand %p677_p0, %p188_p1 }
   0x5   : > { %s678_s28 = sshll.u32 (!%p189_p2), %s673_s19, 4 }
   0x6   : > { %192 = sbr.rel (%p189_p2) target bundleno = 390 (0x186), region = 40  ;;  %p217_p3 = scmp.lt.s32.totalorder (!%p189_p2), %s678_s28, 31 }
   0xb   : > { %v795_v0 = vld [vmem:[%s1047_s1 + $0x38] sm:$0xff]  ;;  %v794_v1 = vld [vmem:[%s1047_s1 + $0x30] sm:$0xff]  ;;  %v793_v2 = vld [vmem:[%s1047_s1 + $0x28] sm:$0xff]  ;;  %s1053_s28 = smov (!%p217_p3, %s678_s28), 31 }
   0xc   : > { %360 = vmatpush.bf16.msra.mxu0 %v795_v0  ;;  %804 = vmatpush.bf16.msra.mxu2 %v795_v0  ;;  %v792_v3 = vld [vmem:[%s1047_s1 + $0x20] sm:$0xff]  ;;  %v791_v4 = vld [vmem:[%s1047_s1 + $0x18] sm:$0xff]  ;;  %v790_v5 = vld [vmem:[%s1047_s1 + $0x10] sm:$0xff]  ;;  %s679_s10 = sshll.u32 %s1053_s28, 2  ;;  %s681_s13 = sshll.u32 %s1053_s28, 3 }
   0xd   : > { %v789_v6 = vld [vmem:[%s1047_s1 + $0x8] sm:$0xff]  ;;  %v788_v7 = vld [vmem:[%s1047_s1] sm:$0xff]  ;;  %s220_s15 = scalar_lea.vmem %s1046_s0, %s679_s10  ;;  %v803_v12 = vld [vmem:[%s1049_s3 + $0x38] sm:$0xff]  ;;  %s979_s16 = scalar_lea.vmem %s1051_s5, %s681_s13 }
   0xe   : > { %v780_v8 = vld [vmem:[%s220_s15] sm:$0xff]  ;;  %v781_v10 = vld [vmem:[%s220_s15 + $0x8] sm:$0xff]  ;;  %501 = vmatpush.bf16.msra.mxu1 %v803_v12  ;;  %v802_v13 = vld [vmem:[%s1049_s3 + $0x30] sm:$0xff]  ;;  %812 = vmatpush.bf16.msra.mxu3 %v803_v12 }
   0xf   : > { %v784_v9 = vld [vmem:[%s220_s15 + $0x20] sm:$0xff]  ;;  %v785_v11 = vld [vmem:[%s220_s15 + $0x28] sm:$0xff]  ;;  %v782_v16 = vld [vmem:[%s220_s15 + $0x10] sm:$0xff] }
  0x10   : > { %361 = vmatpush.bf16.msra.mxu0 %v794_v1  ;;  %805 = vmatpush.bf16.msra.mxu2 %v794_v1  ;;  %v801_v14 = vld [vmem:[%s1049_s3 + $0x28] sm:$0xff]  ;;  %v800_v15 = vld [vmem:[%s1049_s3 + $0x20] sm:$0xff]  ;;  %v786_v17 = vld [vmem:[%s220_s15 + $0x30] sm:$0xff] }
  0x11   : > { %v783_v18 = vld [vmem:[%s220_s15 + $0x18] sm:$0xff]  ;;  %v798_v21 = vld [vmem:[%s1049_s3 + $0x10] sm:$0xff]  ;;  %v797_v22 = vld [vmem:[%s1049_s3 + $0x8] sm:$0xff] }
  0x12   : > { %502 = vmatpush.bf16.msra.mxu1 %v802_v13  ;;  %813 = vmatpush.bf16.msra.mxu3 %v802_v13  ;;  %v787_v19 = vld [vmem:[%s220_s15 + $0x38] sm:$0xff]  ;;  %v796_v23 = vld [vmem:[%s1049_s3] sm:$0xff] }
  0x13   : > { %v799_v20 = vld [vmem:[%s1049_s3 + $0x18] sm:$0xff]  ;;  %v828_v25 = vld [vmem:[%s1048_s2] ss:$0 sm:$0xff] }
  0x14   : > { %362 = vmatpush.bf16.msra.mxu0 %v793_v2  ;;  %806 = vmatpush.bf16.msra.mxu2 %v793_v2 }
  0x16   : > { %503 = vmatpush.bf16.msra.mxu1 %v801_v14  ;;  %814 = vmatpush.bf16.msra.mxu3 %v801_v14 }
  0x18   : > { %363 = vmatpush.bf16.msra.mxu0 %v792_v3  ;;  %807 = vmatpush.bf16.msra.mxu2 %v792_v3 }
  0x1a   : > { %504 = vmatpush.bf16.msra.mxu1 %v800_v15  ;;  %815 = vmatpush.bf16.msra.mxu3 %v800_v15 }
  0x1c   : > { %364 = vmatpush.bf16.msra.mxu0 %v791_v4  ;;  %808 = vmatpush.bf16.msra.mxu2 %v791_v4 }
  0x1e   : > { %505 = vmatpush.bf16.msra.mxu1 %v799_v20  ;;  %816 = vmatpush.bf16.msra.mxu3 %v799_v20  ;;  %v550_v20 = vlaneseq }
  0x20   : > { %365 = vmatpush.bf16.msra.mxu0 %v790_v5  ;;  %809 = vmatpush.bf16.msra.mxu2 %v790_v5 }
  0x22   : > { %506 = vmatpush.bf16.msra.mxu1 %v798_v21  ;;  %817 = vmatpush.bf16.msra.mxu3 %v798_v21 }
  0x24   : > { %366 = vmatpush.bf16.msra.mxu0 %v789_v6  ;;  %810 = vmatpush.bf16.msra.mxu2 %v789_v6 }
  0x26   : > { %507 = vmatpush.bf16.msra.mxu1 %v797_v22  ;;  %818 = vmatpush.bf16.msra.mxu3 %v797_v22  ;;  %v971_v22 = vand.u32 127, %v550_v20 }
  0x28   : > { %367 = vmatpush.bf16.msra.mxu0 %v788_v7  ;;  %811 = vmatpush.bf16.msra.mxu2 %v788_v7  ;;  %vm552_vm0 = vcmp.ge.s32.totalorder %v971_v22, 16 }
  0x2a   : > { %508 = vmatpush.bf16.msra.mxu1 %v796_v23  ;;  %819 = vmatpush.bf16.msra.mxu3 %v796_v23 }
  0x2b   : > { %368 = vmatmul.bf16.vlgmr.msra.gmra.mxu0 %v780_v8  ;;  %388 = vmatmul.bf16.vlgmr.msra.gmra.mxu2 %v784_v9 }
  0x3b   : > { %373 = vmatmul.bf16.gmra.mxu0 %v781_v10  ;;  %393 = vmatmul.bf16.gmra.mxu2 %v785_v11 }
  0x4b   : > { %378 = vmatmul.bf16.gmra.mxu0 %v782_v16  ;;  %398 = vmatmul.bf16.gmra.mxu2 %v786_v17  ;;  %v968_v17 = vld [vmem:[%s1050_s4] ss:$0 sm:$0xff] }
  0x5b   : > { %383 = vmatmul.bf16.gmra.mxu0 %v783_v18  ;;  %403 = vmatmul.bf16.gmra.mxu2 %v787_v19 }
  0xa8   : > { %v369_v24 = vpop.f32.mrf.mxu0 }
  0xa9   : > { %v370_v26 = vadd.f32 %v828_v25, %v369_v24 }
  0xab   : > { %v409_v29 = vmax.f32 %v370_v26, 0.0 }
  0xae   : > { %v389_v27 = vpop.f32.mrf.mxu2 }
  0xaf   : > { %v390_v32 = vadd.f32 %v828_v25, %v389_v27 }
  0xb0   : > { %v371_v28 = vpop.f32.mrf.mxu0 }
  0xb1   : > { %v372_v30 = vadd.f32 %v828_v25, %v371_v28  ;;  %v417_v37 = vmax.f32 %v390_v32, 0.0 }
  0xb3   : > { %v410_v31 = vmax.f32 %v372_v30, 0.0 }
  0xb5   : > { %v425_v33 = vpack.c.bf16 %v410_v31, %v409_v29 }
  0xb6   : > { %v391_v34 = vpop.f32.mrf.mxu2 }
  0xb7   : > { %v392_v35 = vadd.f32 %v828_v25, %v391_v34  ;;  %509 = vmatmul.bf16.vlgmr.msra.gmra.mxu1 %v425_v33 }
  0xb8   : > { %v374_v36 = vpop.f32.mrf.mxu0 }
  0xb9   : > { %v418_v38 = vmax.f32 %v392_v35, 0.0  ;;  %v375_v40 = vadd.f32 %v828_v25, %v374_v36 }
  0xbb   : > { %v429_v39 = vpack.c.bf16 %v418_v38, %v417_v37  ;;  %v411_v43 = vmax.f32 %v375_v40, 0.0 }
  0xbd   : > { %529 = vmatmul.bf16.vlgmr.msra.gmra.mxu3 %v429_v39 }
  0xbe   : > { %v394_v41 = vpop.f32.mrf.mxu2 }
  0xbf   : > { %v395_v46 = vadd.f32 %v828_v25, %v394_v41 }
  0xc0   : > { %v376_v42 = vpop.f32.mrf.mxu0 }
  0xc1   : > { %v377_v44 = vadd.f32 %v828_v25, %v376_v42  ;;  %v419_v51 = vmax.f32 %v395_v46, 0.0 }
  0xc3   : > { %v412_v45 = vmax.f32 %v377_v44, 0.0 }
  0xc5   : > { %v426_v47 = vpack.c.bf16 %v412_v45, %v411_v43 }
  0xc6   : > { %v396_v48 = vpop.f32.mrf.mxu2 }
  0xc7   : > { %v397_v49 = vadd.f32 %v828_v25, %v396_v48  ;;  %514 = vmatmul.bf16.gmra.mxu1 %v426_v47 }
  0xc8   : > { %v379_v50 = vpop.f32.mrf.mxu0 }
  0xc9   : > { %v420_v52 = vmax.f32 %v397_v49, 0.0  ;;  %v380_v54 = vadd.f32 %v828_v25, %v379_v50 }
  0xcb   : > { %v430_v53 = vpack.c.bf16 %v420_v52, %v419_v51  ;;  %v413_v57 = vmax.f32 %v380_v54, 0.0 }
  0xcd   : > { %534 = vmatmul.bf16.gmra.mxu3 %v430_v53 }
  0xce   : > { %v399_v55 = vpop.f32.mrf.mxu2 }
  0xcf   : > { %v400_v60 = vadd.f32 %v828_v25, %v399_v55 }
  0xd0   : > { %v381_v56 = vpop.f32.mrf.mxu0 }
  0xd1   : > { %v382_v58 = vadd.f32 %v828_v25, %v381_v56  ;;  %v421_v1 = vmax.f32 %v400_v60, 0.0 }
  0xd3   : > { %v414_v59 = vmax.f32 %v382_v58, 0.0 }
  0xd5   : > { %v427_v61 = vpack.c.bf16 %v414_v59, %v413_v57 }
  0xd6   : > { %v401_v62 = vpop.f32.mrf.mxu2 }
  0xd7   : > { %v402_v63 = vadd.f32 %v828_v25, %v401_v62  ;;  %519 = vmatmul.bf16.gmra.mxu1 %v427_v61 }
  0xd8   : > { %v384_v0 = vpop.f32.mrf.mxu0 }
  0xd9   : > { %v422_v2 = vmax.f32 %v402_v63, 0.0  ;;  %v385_v4 = vadd.f32 %v828_v25, %v384_v0 }
  0xdb   : > { %v431_v3 = vpack.c.bf16 %v422_v2, %v421_v1  ;;  %v415_v7 = vmax.f32 %v385_v4, 0.0 }
  0xdd   : > { %539 = vmatmul.bf16.gmra.mxu3 %v431_v3 }
  0xde   : > { %v404_v5 = vpop.f32.mrf.mxu2 }
  0xdf   : > { %v405_v10 = vadd.f32 %v828_v25, %v404_v5 }
  0xe0   : > { %v386_v6 = vpop.f32.mrf.mxu0 }
  0xe1   : > { %v387_v8 = vadd.f32 %v828_v25, %v386_v6  ;;  %v423_v14 = vmax.f32 %v405_v10, 0.0 }
  0xe3   : > { %v416_v9 = vmax.f32 %v387_v8, 0.0 }
  0xe5   : > { %v428_v11 = vpack.c.bf16 %v416_v9, %v415_v7 }
  0xe6   : > { %v406_v12 = vpop.f32.mrf.mxu2 }
  0xe7   : > { %v407_v13 = vadd.f32 %v828_v25, %v406_v12  ;;  %524 = vmatmul.bf16.gmra.mxu1 %v428_v11 }
  0xe9   : > { %v424_v15 = vmax.f32 %v407_v13, 0.0 }
  0xeb   : > { %v432_v16 = vpack.c.bf16 %v424_v15, %v423_v14 }
  0xed   : > { %544 = vmatmul.bf16.gmra.mxu3 %v432_v16 }
 0x134   : > { %v510_v18 = vpop.f32.mrf.mxu1 }
 0x135   : > { %v511_v19 = vadd.f32 %v968_v17, %v510_v18 }
 0x137   : > { %v553_v21 = vmul.f32 1.442695, %v511_v19 }
 0x139   : > { %830 = vpow2.f32 %v553_v21 }
 0x13c   : > { %v512_v23 = vpop.f32.mrf.mxu1 }
 0x13d   : > { %v513_v24 = vadd.f32 %v968_v17, %v512_v23 }
 0x13f   : > { %v831_v25 = vpop.eup %830  ;;  %v555_v26 = vmul.f32 1.442695, %v513_v24 }
 0x140   : > { %v585_v27 = vsel %vm552_vm0, %v831_v25, %v511_v19  ;;  %v530_v28 = vpop.f32.mrf.mxu3 }
 0x141   : > { %601 = vst [vmem:[%s979_s16] sm:$0xff] %v585_v27  ;;  %832 = vpow2.f32 %v555_v26  ;;  %v531_v29 = vadd.f32 %v968_v17, %v530_v28 }
 0x143   : > { %v569_v30 = vmul.f32 1.442695, %v531_v29 }
 0x144   : > { %v515_v31 = vpop.f32.mrf.mxu1 }
 0x145   : > { %834 = vpow2.f32 %v569_v30  ;;  %v516_v32 = vadd.f32 %v968_v17, %v515_v31 }
 0x147   : > { %v833_v33 = vpop.eup %832  ;;  %v557_v34 = vmul.f32 1.442695, %v516_v32 }
 0x148   : > { %v586_v35 = vsel %vm552_vm0, %v833_v33, %v513_v24  ;;  %v532_v36 = vpop.f32.mrf.mxu3 }
 0x149   : > { %602 = vst [vmem:[%s979_s16 + $0x8] sm:$0xff] %v586_v35  ;;  %836 = vpow2.f32 %v557_v34  ;;  %v533_v37 = vadd.f32 %v968_v17, %v532_v36 }
 0x14b   : > { %v835_v38 = vpop.eup %834  ;;  %v571_v39 = vmul.f32 1.442695, %v533_v37 }
 0x14c   : > { %v593_v40 = vsel %vm552_vm0, %v835_v38, %v531_v29  ;;  %v517_v41 = vpop.f32.mrf.mxu1 }
 0x14d   : > { %609 = vst [vmem:[%s979_s16 + $0x40] sm:$0xff] %v593_v40  ;;  %838 = vpow2.f32 %v571_v39  ;;  %v518_v42 = vadd.f32 %v968_v17, %v517_v41 }
 0x14f   : > { %v837_v43 = vpop.eup %836  ;;  %v559_v44 = vmul.f32 1.442695, %v518_v42 }
 0x150   : > { %v587_v45 = vsel %vm552_vm0, %v837_v43, %v516_v32  ;;  %v535_v46 = vpop.f32.mrf.mxu3 }
 0x151   : > { %603 = vst [vmem:[%s979_s16 + $0x10] sm:$0xff] %v587_v45  ;;  %840 = vpow2.f32 %v559_v44  ;;  %v536_v47 = vadd.f32 %v968_v17, %v535_v46 }
 0x153   : > { %v839_v48 = vpop.eup %838  ;;  %v573_v49 = vmul.f32 1.442695, %v536_v47 }
 0x154   : > { %v594_v50 = vsel %vm552_vm0, %v839_v48, %v533_v37  ;;  %v520_v51 = vpop.f32.mrf.mxu1 }
 0x155   : > { %610 = vst [vmem:[%s979_s16 + $0x48] sm:$0xff] %v594_v50  ;;  %842 = vpow2.f32 %v573_v49  ;;  %v521_v52 = vadd.f32 %v968_v17, %v520_v51 }
 0x157   : > { %v841_v53 = vpop.eup %840  ;;  %v561_v54 = vmul.f32 1.442695, %v521_v52 }
 0x158   : > { %v588_v55 = vsel %vm552_vm0, %v841_v53, %v518_v42  ;;  %v537_v56 = vpop.f32.mrf.mxu3 }
 0x159   : > { %604 = vst [vmem:[%s979_s16 + $0x18] sm:$0xff] %v588_v55  ;;  %844 = vpow2.f32 %v561_v54  ;;  %v538_v57 = vadd.f32 %v968_v17, %v537_v56 }
 0x15b   : > { %v843_v58 = vpop.eup %842  ;;  %v575_v59 = vmul.f32 1.442695, %v538_v57 }
 0x15c   : > { %v595_v60 = vsel %vm552_vm0, %v843_v58, %v536_v47  ;;  %v522_v61 = vpop.f32.mrf.mxu1 }
 0x15d   : > { %611 = vst [vmem:[%s979_s16 + $0x50] sm:$0xff] %v595_v60  ;;  %846 = vpow2.f32 %v575_v59  ;;  %v523_v62 = vadd.f32 %v968_v17, %v522_v61 }
 0x15f   : > { %v845_v63 = vpop.eup %844  ;;  %v563_v0 = vmul.f32 1.442695, %v523_v62 }
 0x160   : > { %v589_v1 = vsel %vm552_vm0, %v845_v63, %v521_v52  ;;  %v540_v2 = vpop.f32.mrf.mxu3 }
 0x161   : > { %605 = vst [vmem:[%s979_s16 + $0x20] sm:$0xff] %v589_v1  ;;  %848 = vpow2.f32 %v563_v0  ;;  %v541_v3 = vadd.f32 %v968_v17, %v540_v2 }
 0x163   : > { %v847_v4 = vpop.eup %846  ;;  %v577_v5 = vmul.f32 1.442695, %v541_v3 }
 0x164   : > { %v596_v6 = vsel %vm552_vm0, %v847_v4, %v538_v57  ;;  %v525_v7 = vpop.f32.mrf.mxu1 }
 0x165   : > { %612 = vst [vmem:[%s979_s16 + $0x58] sm:$0xff] %v596_v6  ;;  %850 = vpow2.f32 %v577_v5  ;;  %v526_v8 = vadd.f32 %v968_v17, %v525_v7 }
 0x167   : > { %v849_v9 = vpop.eup %848  ;;  %v565_v10 = vmul.f32 1.442695, %v526_v8 }
 0x168   : > { %v590_v11 = vsel %vm552_vm0, %v849_v9, %v523_v62  ;;  %v542_v12 = vpop.f32.mrf.mxu3 }
 0x169   : > { %606 = vst [vmem:[%s979_s16 + $0x28] sm:$0xff] %v590_v11  ;;  %852 = vpow2.f32 %v565_v10  ;;  %v543_v13 = vadd.f32 %v968_v17, %v542_v12 }
 0x16b   : > { %v851_v14 = vpop.eup %850  ;;  %v579_v15 = vmul.f32 1.442695, %v543_v13 }
 0x16c   : > { %v597_v16 = vsel %vm552_vm0, %v851_v14, %v541_v3  ;;  %v527_v18 = vpop.f32.mrf.mxu1 }
 0x16d   : > { %613 = vst [vmem:[%s979_s16 + $0x60] sm:$0xff] %v597_v16  ;;  %854 = vpow2.f32 %v579_v15  ;;  %v528_v19 = vadd.f32 %v968_v17, %v527_v18 }
 0x16f   : > { %v853_v20 = vpop.eup %852  ;;  %v567_v21 = vmul.f32 1.442695, %v528_v19 }
 0x170   : > { %v591_v23 = vsel %vm552_vm0, %v853_v20, %v526_v8  ;;  %v545_v24 = vpop.f32.mrf.mxu3 }
 0x171   : > { %607 = vst [vmem:[%s979_s16 + $0x30] sm:$0xff] %v591_v23  ;;  %856 = vpow2.f32 %v567_v21  ;;  %v546_v25 = vadd.f32 %v968_v17, %v545_v24 }
 0x173   : > { %v855_v26 = vpop.eup %854  ;;  %v581_v27 = vmul.f32 1.442695, %v546_v25 }
 0x174   : > { %v598_v28 = vsel %vm552_vm0, %v855_v26, %v543_v13 }
 0x175   : > { %614 = vst [vmem:[%s979_s16 + $0x68] sm:$0xff] %v598_v28  ;;  %858 = vpow2.f32 %v581_v27 }
 0x177   : > { %v857_v29 = vpop.eup %856 }
 0x178   : > { %v592_v30 = vsel %vm552_vm0, %v857_v29, %v528_v19  ;;  %v547_v31 = vpop.f32.mrf.mxu3 }
 0x179   : > { %608 = vst [vmem:[%s979_s16 + $0x38] sm:$0xff] %v592_v30  ;;  %v548_v32 = vadd.f32 %v968_v17, %v547_v31 }
 0x17b   : > { %v859_v33 = vpop.eup %858  ;;  %v583_v34 = vmul.f32 1.442695, %v548_v32 }
 0x17c   : > { %v599_v35 = vsel %vm552_vm0, %v859_v33, %v546_v25 }
 0x17d   : > { %615 = vst [vmem:[%s979_s16 + $0x70] sm:$0xff] %v599_v35  ;;  %860 = vpow2.f32 %v583_v34 }
 0x183   : > { %v861_v36 = vpop.eup %860 }
 0x184   : > { %v600_v37 = vsel %vm552_vm0, %v861_v36, %v548_v32 }
 0x185   : > { %616 = vst [vmem:[%s979_s16 + $0x78] sm:$0xff] %v600_v37 }
 0x186 PF: > { %s15_s18 = sadd.s32 1, %s868_s18  }
 0x187   : > { %p12_p4 = scmp.ge.s32.totalorder %s15_s18, 4  }
 0x189   :  { %14 = sbr.rel (!%p12_p4) target bundleno = 1 (0x1), region = 70 }

</bundles_post_ra>
